<compile_context>
chip_gen: v5e
topology: v5e:2x2
jax: 0.10.0
libtpu: 0.0.40
codegen_flags: <defaults>
</compile_context>

<pallas_src>
import jax
import jax.numpy as jnp
from jax.experimental import pallas as pl
from jax.experimental.pallas import tpu as pltpu


LANE = 128                 # feature dims padded to the 128-lane vreg width
SUBLANE = 8                # batch tiles rounded to the 8-row sublane
MAX_BATCH_TILE = 1024      # per-tile batch cap on v5e/v6e (128 MiB VMEM)
MAX_BATCH_TILE_V7X = 512   # tighter cap on v7x (64 MiB physical VMEM)
V7X_SPLIT_MIN_BATCH = 256  # below this a 2nd grid step costs more than it saves

_WEIGHT_SINGLE_BUFFER_OK = None   # resolved on first kernel call


def _round_up(x: int, m: int) -> int:
    return ((x + m - 1) // m) * m


def _num_tensorcores_per_chip() -> int:
    """2 on v7x (megacore sharding target), 1 on v5e/v6e."""
    try:
        kind = jax.devices()[0].device_kind.lower()
    except Exception:
        return 1
    return 2 if ("v7" in kind or "7x" in kind) else 1


def _batch_tiling(batch: int):
    """(num_tiles, tile_rows, padded_batch) with minimal dead rows."""
    num_tc = _num_tensorcores_per_chip()
    max_tb = MAX_BATCH_TILE_V7X if num_tc > 1 else MAX_BATCH_TILE
    n = pl.cdiv(batch, max_tb)
    if num_tc > 1 and batch >= V7X_SPLIT_MIN_BATCH:
        n = max(n, num_tc)       # give the second TensorCore a tile of work
    if n == 1:
        return 1, batch, batch   # full-array block: no batch padding at all
    tb = _round_up(pl.cdiv(batch, n), SUBLANE)
    return n, tb, n * tb


def _vmem_limit_bytes(tb: int, input_dim: int, HP: int, OP: int) -> int:
    """Conservative (double-buffered) tile footprint + headroom, <= 64 MiB."""
    act_in = 2 * tb * input_dim * 4                           # f32 x tile x2
    act_out = 2 * tb * OP * 4                                 # f32 out tile x2
    weights = 2 * 2 * (input_dim * HP + HP * HP + HP * OP)    # bf16 weights x2
    biases = 2 * 4 * (2 * HP + OP)                            # f32 biases x2
    inter = 2 * tb * HP * 4                                   # f32 h1/h2
    need = act_in + act_out + weights + biases + inter
    return int(min(max(2 * need + (4 << 20), 32 << 20), 64 << 20))


def qnetwork_kernel(x_ref, w1_ref, b1_ref, w2_ref, b2_ref, w3_ref, b3_ref,
                    out_ref):
    # bf16 cast of the activations happens here (VALU; hides under MXU/DMA)
    # instead of as a separate padded-copy HLO in the wrapper.
    x = x_ref[...].astype(jnp.bfloat16)

    # Layer 1: Linear + ReLU (f32 accumulation/epilogue, bf16 for next dot)
    h1 = jnp.dot(x, w1_ref[...], preferred_element_type=jnp.float32)
    h1 = jnp.maximum(h1 + b1_ref[...], 0.0).astype(jnp.bfloat16)

    # Layer 2: Linear + ReLU
    h2 = jnp.dot(h1, w2_ref[...], preferred_element_type=jnp.float32)
    h2 = jnp.maximum(h2 + b2_ref[...], 0.0).astype(jnp.bfloat16)

    # Layer 3: Linear (no activation)
    y = jnp.dot(h2, w3_ref[...], preferred_element_type=jnp.float32)
    out_ref[...] = (y + b3_ref[...]).astype(out_ref.dtype)


def prepare_params(params):
    """Pad feature dims to the 128-lane width and cast matmul operands to bf16.

    Run ONCE (e.g. after (re)loading weights).  Passing the result to
    qnetwork_forward avoids re-running these pads/casts on every forward call.
    w1 keeps its unpadded K (= input_dim) so x never needs feature padding.
    Zero padding is exact: padded hidden cols get bias 0 -> ReLU 0 and contract
    against zero rows of the next weight; padded output cols are sliced off.
    """
    w1, b1 = params["w1"], params["b1"]
    w2, b2 = params["w2"], params["b2"]
    w3, b3 = params["w3"], params["b3"]
    input_dim, hidden_dim = w1.shape
    output_dim = w3.shape[1]
    HP = _round_up(hidden_dim, LANE)
    OP = _round_up(output_dim, LANE)
    ph, po = HP - hidden_dim, OP - output_dim
    return {
        "w1": jnp.pad(w1, ((0, 0), (0, ph))).astype(jnp.bfloat16),
        "b1": jnp.pad(b1, ((0, 0), (0, ph))).astype(jnp.float32),
        "w2": jnp.pad(w2, ((0, ph), (0, ph))).astype(jnp.bfloat16),
        "b2": jnp.pad(b2, ((0, 0), (0, ph))).astype(jnp.float32),
        "w3": jnp.pad(w3, ((0, ph), (0, po))).astype(jnp.bfloat16),
        "b3": jnp.pad(b3, ((0, 0), (0, po))).astype(jnp.float32),
        "dims": (int(input_dim), int(hidden_dim), int(output_dim)),
    }


def qnetwork_forward(x, prepared):
    """x: (batch, input_dim) f32.  prepared: output of prepare_params()."""
    input_dim, hidden_dim, output_dim = prepared["dims"]
    assert x.shape[1] == input_dim
    batch = x.shape[0]
    HP = _round_up(hidden_dim, LANE)
    OP = _round_up(output_dim, LANE)

    n_tiles, TB, BP = _batch_tiling(batch)
    # Only the batch axis is (rarely) padded; features stay unpadded & f32.
    xin = x if BP == batch else jnp.pad(x, ((0, BP - batch), (0, 0)))

    flops = 2 * BP * (input_dim * HP + HP * HP + HP * OP)
    bytes_accessed = (
        BP * input_dim * 4                                    # f32 x in
        + 2 * (input_dim * HP + HP * HP + HP * OP)            # bf16 weights
        + 4 * (2 * HP + OP)                                   # f32 biases
        + BP * OP * 4)                                        # f32 out

    def build(weight_mode):
        wkw = {} if weight_mode is None else {"pipeline_mode": weight_mode}
        return pl.pallas_call(
            qnetwork_kernel,
            out_shape=jax.ShapeDtypeStruct((BP, OP), jnp.float32),
            grid_spec=pl.GridSpec(
                grid=(n_tiles,),
                in_specs=[
                    pl.BlockSpec((TB, input_dim), lambda i: (i, 0)),     # x
                    pl.BlockSpec((input_dim, HP), lambda i: (0, 0), **wkw),
                    pl.BlockSpec((1, HP), lambda i: (0, 0), **wkw),
                    pl.BlockSpec((HP, HP), lambda i: (0, 0), **wkw),
                    pl.BlockSpec((1, HP), lambda i: (0, 0), **wkw),
                    pl.BlockSpec((HP, OP), lambda i: (0, 0), **wkw),
                    pl.BlockSpec((1, OP), lambda i: (0, 0), **wkw),
                ],
                out_specs=pl.BlockSpec((TB, OP), lambda i: (i, 0)),
            ),
            compiler_params=pltpu.CompilerParams(
                dimension_semantics=("parallel",),   # shards tiles on v7x TCs
                vmem_limit_bytes=_vmem_limit_bytes(TB, input_dim, HP, OP)),
            cost_estimate=pl.CostEstimate(
                flops=flops, transcendentals=0, bytes_accessed=bytes_accessed),
        )

    args = (xin, prepared["w1"], prepared["b1"], prepared["w2"],
            prepared["b2"], prepared["w3"], prepared["b3"])

    # Constant-index weight blocks don't need double buffering; request a
    # single buffer (halves resident weight VMEM, matters on v7x), falling
    # back to default buffering if this Pallas build rejects pipeline_mode.
    global _WEIGHT_SINGLE_BUFFER_OK
    if _WEIGHT_SINGLE_BUFFER_OK is None:
        try:
            out_padded = build(pl.Buffered(1))(*args)
            _WEIGHT_SINGLE_BUFFER_OK = True
        except Exception:
            _WEIGHT_SINGLE_BUFFER_OK = False
            out_padded = build(None)(*args)
    else:
        mode = pl.Buffered(1) if _WEIGHT_SINGLE_BUFFER_OK else None
        out_padded = build(mode)(*args)

    # TODO(synk): callers that can consume the padded (BP, OP) buffer directly
    # can skip this slice (one fewer HBM copy per call).
    return out_padded[:batch, :output_dim]


def init_params(key, input_dim, hidden_dim, output_dim):
    """Deterministic init mimicking nn.Linear's uniform(-1/sqrt(fan_in), ...)."""
    ks = jax.random.split(key, 6)

    def linear(kw, kb, fan_in, fan_out):
        bound = 1.0 / jnp.sqrt(jnp.float32(fan_in))
        w = jax.random.uniform(kw, (fan_in, fan_out), jnp.float32,
                               minval=-bound, maxval=bound)
        b = jax.random.uniform(kb, (1, fan_out), jnp.float32,
                               minval=-bound, maxval=bound)
        return w, b

    w1, b1 = linear(ks[0], ks[1], input_dim, hidden_dim)
    w2, b2 = linear(ks[2], ks[3], hidden_dim, hidden_dim)
    w3, b3 = linear(ks[4], ks[5], hidden_dim, output_dim)
    return {"w1": w1, "b1": b1, "w2": w2, "b2": b2, "w3": w3, "b3": b3}


def reference_forward_f32(x, p):
    h = jnp.maximum(x @ p["w1"] + p["b1"], 0.0)
    h = jnp.maximum(h @ p["w2"] + p["b2"], 0.0)
    return h @ p["w3"] + p["b3"]


def reference_forward_bf16(x, p):
    """Same precision recipe as the kernel: bf16 operands, f32 accumulation."""
    bf = jnp.bfloat16
    h = jnp.dot(x.astype(bf), p["w1"].astype(bf),
                preferred_element_type=jnp.float32)
    h = jnp.maximum(h + p["b1"], 0.0).astype(bf)
    h = jnp.dot(h, p["w2"].astype(bf), preferred_element_type=jnp.float32)
    h = jnp.maximum(h + p["b2"], 0.0).astype(bf)
    y = jnp.dot(h, p["w3"].astype(bf), preferred_element_type=jnp.float32)
    return y + p["b3"]


if __name__ == "__main__":
    batch, input_dim, hidden_dim, output_dim = 8, 16, 32, 4

    key = jax.random.PRNGKey(0)
    kx, kp = jax.random.split(key)
    x = jax.random.normal(kx, (batch, input_dim), jnp.float32)
    params = init_params(kp, input_dim, hidden_dim, output_dim)

    prepared = prepare_params(params)   # pads/casts once, outside the step

    out = jax.block_until_ready(qnetwork_forward(x, prepared))
    assert out.shape == (batch, output_dim)

    # Tight check against a reference using the same bf16-operand / f32-accum
    # recipe, plus a loose sanity check against the pure-f32 reference
    # (matmul operands are bf16, so Q-values differ slightly from f32 torch).
    ref_bf16 = reference_forward_bf16(x, params)
    ref_f32 = reference_forward_f32(x, params)
    assert jnp.allclose(out, ref_bf16, atol=1e-4, rtol=1e-4), "mismatch vs bf16 ref"
    assert jnp.allclose(out, ref_f32, atol=5e-2, rtol=5e-2), "mismatch vs f32 ref"

    print("KERNEL_OK")
</pallas_src>

<mosaic_0001>
module attributes {stable_mosaic.version = 11 : i64} {
  func.func @qnetwork_kernel(%arg0: i32, %arg1: memref<8x16xf32, #tpu.memory_space<vmem>>, %arg2: memref<16x128xbf16, #tpu.memory_space<vmem>>, %arg3: memref<1x128xf32, #tpu.memory_space<vmem>>, %arg4: memref<128x128xbf16, #tpu.memory_space<vmem>>, %arg5: memref<1x128xf32, #tpu.memory_space<vmem>>, %arg6: memref<128x128xbf16, #tpu.memory_space<vmem>>, %arg7: memref<1x128xf32, #tpu.memory_space<vmem>>, %arg8: memref<8x128xf32, #tpu.memory_space<vmem>>) attributes {dimension_semantics = [#tpu.dimension_semantics<parallel>], iteration_bounds = array<i64: 1>, scalar_prefetch = 0 : i64, scratch_operands = 0 : i64, tpu.core_type = #tpu.core_type<tc>, window_params = [{transform_indices = @transform_0, window_bounds = array<i64: 8, 16>}, {pipeline_mode = #tpu.pipeline_mode<synchronous>, transform_indices = @transform_1, window_bounds = array<i64: 16, 128>}, {pipeline_mode = #tpu.pipeline_mode<synchronous>, transform_indices = @transform_2, window_bounds = array<i64: 1, 128>}, {pipeline_mode = #tpu.pipeline_mode<synchronous>, transform_indices = @transform_3, window_bounds = array<i64: 128, 128>}, {pipeline_mode = #tpu.pipeline_mode<synchronous>, transform_indices = @transform_4, window_bounds = array<i64: 1, 128>}, {pipeline_mode = #tpu.pipeline_mode<synchronous>, transform_indices = @transform_5, window_bounds = array<i64: 128, 128>}, {pipeline_mode = #tpu.pipeline_mode<synchronous>, transform_indices = @transform_6, window_bounds = array<i64: 1, 128>}, {transform_indices = @transform_7, window_bounds = array<i64: 8, 128>}]} {
    %c0 = arith.constant 0 : index
    %c0_0 = arith.constant 0 : index
    %0 = vector.load %arg1[%c0, %c0_0] : memref<8x16xf32, #tpu.memory_space<vmem>>, vector<8x16xf32>
    %1 = arith.truncf %0 : vector<8x16xf32> to vector<8x16xbf16>
    %c0_1 = arith.constant 0 : index
    %c0_2 = arith.constant 0 : index
    %2 = vector.load %arg2[%c0_1, %c0_2] : memref<16x128xbf16, #tpu.memory_space<vmem>>, vector<16x128xbf16>
    %cst = arith.constant dense<0.000000e+00> : vector<8x128xf32>
    %3 = tpu.matmul %1, %2, %cst {dimension_numbers = #tpu.dot_dimension_numbers<[1], [0], [0], [1], [0, 0, 1, 1], [], []>} : vector<8x16xbf16>, vector<16x128xbf16>, vector<8x128xf32> -> vector<8x128xf32>
    %c0_3 = arith.constant 0 : index
    %c0_4 = arith.constant 0 : index
    %4 = vector.load %arg3[%c0_3, %c0_4] : memref<1x128xf32, #tpu.memory_space<vmem>>, vector<1x128xf32>
    %5 = vector.broadcast %4 : vector<1x128xf32> to vector<8x128xf32>
    %6 = arith.addf %3, %5 : vector<8x128xf32>
    %cst_5 = arith.constant 0.000000e+00 : f32
    %7 = vector.broadcast %cst_5 : f32 to vector<8x128xf32>
    %8 = arith.maximumf %6, %7 : vector<8x128xf32>
    %9 = arith.truncf %8 : vector<8x128xf32> to vector<8x128xbf16>
    %c0_6 = arith.constant 0 : index
    %c0_7 = arith.constant 0 : index
    %10 = vector.load %arg4[%c0_6, %c0_7] : memref<128x128xbf16, #tpu.memory_space<vmem>>, vector<128x128xbf16>
    %cst_8 = arith.constant dense<0.000000e+00> : vector<8x128xf32>
    %11 = tpu.matmul %9, %10, %cst_8 {dimension_numbers = #tpu.dot_dimension_numbers<[1], [0], [0], [1], [0, 0, 1, 1], [], []>} : vector<8x128xbf16>, vector<128x128xbf16>, vector<8x128xf32> -> vector<8x128xf32>
    %c0_9 = arith.constant 0 : index
    %c0_10 = arith.constant 0 : index
    %12 = vector.load %arg5[%c0_9, %c0_10] : memref<1x128xf32, #tpu.memory_space<vmem>>, vector<1x128xf32>
    %13 = vector.broadcast %12 : vector<1x128xf32> to vector<8x128xf32>
    %14 = arith.addf %11, %13 : vector<8x128xf32>
    %cst_11 = arith.constant 0.000000e+00 : f32
    %15 = vector.broadcast %cst_11 : f32 to vector<8x128xf32>
    %16 = arith.maximumf %14, %15 : vector<8x128xf32>
    %17 = arith.truncf %16 : vector<8x128xf32> to vector<8x128xbf16>
    %c0_12 = arith.constant 0 : index
    %c0_13 = arith.constant 0 : index
    %18 = vector.load %arg6[%c0_12, %c0_13] : memref<128x128xbf16, #tpu.memory_space<vmem>>, vector<128x128xbf16>
    %cst_14 = arith.constant dense<0.000000e+00> : vector<8x128xf32>
    %19 = tpu.matmul %17, %18, %cst_14 {dimension_numbers = #tpu.dot_dimension_numbers<[1], [0], [0], [1], [0, 0, 1, 1], [], []>} : vector<8x128xbf16>, vector<128x128xbf16>, vector<8x128xf32> -> vector<8x128xf32>
    %c0_15 = arith.constant 0 : index
    %c0_16 = arith.constant 0 : index
    %20 = vector.load %arg7[%c0_15, %c0_16] : memref<1x128xf32, #tpu.memory_space<vmem>>, vector<1x128xf32>
    %21 = vector.broadcast %20 : vector<1x128xf32> to vector<8x128xf32>
    %22 = arith.addf %19, %21 : vector<8x128xf32>
    %c0_17 = arith.constant 0 : index
    %c0_18 = arith.constant 0 : index
    %23 = vector.load %arg8[%c0_17, %c0_18] : memref<8x128xf32, #tpu.memory_space<vmem>>, vector<8x128xf32>
    tpu.vector_store %arg8[%c0_17, %c0_18], %22 {strides = array<i32>} : memref<8x128xf32, #tpu.memory_space<vmem>>, vector<8x128xf32>,
    return
  }
  func.func @transform_0(%arg0: i32) -> (i32, i32) {
    %c0_i32 = arith.constant 0 : i32
    %c0_i32_0 = arith.constant 0 : i32
    return %arg0, %c0_i32 : i32, i32
  }
  func.func @transform_1(%arg0: i32) -> (i32, i32) {
    %c0_i32 = arith.constant 0 : i32
    %c0_i32_0 = arith.constant 0 : i32
    %c0_i32_1 = arith.constant 0 : i32
    return %c0_i32, %c0_i32_0 : i32, i32
  }
  func.func @transform_2(%arg0: i32) -> (i32, i32) {
    %c0_i32 = arith.constant 0 : i32
    %c0_i32_0 = arith.constant 0 : i32
    %c0_i32_1 = arith.constant 0 : i32
    return %c0_i32, %c0_i32_0 : i32, i32
  }
  func.func @transform_3(%arg0: i32) -> (i32, i32) {
    %c0_i32 = arith.constant 0 : i32
    %c0_i32_0 = arith.constant 0 : i32
    %c0_i32_1 = arith.constant 0 : i32
    return %c0_i32, %c0_i32_0 : i32, i32
  }
  func.func @transform_4(%arg0: i32) -> (i32, i32) {
    %c0_i32 = arith.constant 0 : i32
    %c0_i32_0 = arith.constant 0 : i32
    %c0_i32_1 = arith.constant 0 : i32
    return %c0_i32, %c0_i32_0 : i32, i32
  }
  func.func @transform_5(%arg0: i32) -> (i32, i32) {
    %c0_i32 = arith.constant 0 : i32
    %c0_i32_0 = arith.constant 0 : i32
    %c0_i32_1 = arith.constant 0 : i32
    return %c0_i32, %c0_i32_0 : i32, i32
  }
  func.func @transform_6(%arg0: i32) -> (i32, i32) {
    %c0_i32 = arith.constant 0 : i32
    %c0_i32_0 = arith.constant 0 : i32
    %c0_i32_1 = arith.constant 0 : i32
    return %c0_i32, %c0_i32_0 : i32, i32
  }
  func.func @transform_7(%arg0: i32) -> (i32, i32) {
    %c0_i32 = arith.constant 0 : i32
    %c0_i32_0 = arith.constant 0 : i32
    return %arg0, %c0_i32 : i32, i32
  }
}

module attributes {stable_mosaic.version = 11 : i64} {
  func.func @qnetwork_kernel(%arg0: i32, %arg1: memref<8x16xf32, #tpu.memory_space<vmem>>, %arg2: memref<16x128xbf16, #tpu.memory_space<vmem>>, %arg3: memref<1x128xf32, #tpu.memory_space<vmem>>, %arg4: memref<128x128xbf16, #tpu.memory_space<vmem>>, %arg5: memref<1x128xf32, #tpu.memory_space<vmem>>, %arg6: memref<128x128xbf16, #tpu.memory_space<vmem>>, %arg7: memref<1x128xf32, #tpu.memory_space<vmem>>, %arg8: memref<8x128xf32, #tpu.memory_space<vmem>>) attributes {dimension_semantics = [#tpu.dimension_semantics<parallel>], iteration_bounds = array<i64: 1>, scalar_prefetch = 0 : i64, scratch_operands = 0 : i64, tpu.core_type = #tpu.core_type<tc>, window_params = [{transform_indices = @transform_0, window_bounds = array<i64: 8, 16>}, {pipeline_mode = #tpu.pipeline_mode<synchronous>, transform_indices = @transform_1, window_bounds = array<i64: 16, 128>}, {pipeline_mode = #tpu.pipeline_mode<synchronous>, transform_indices = @transform_2, window_bounds = array<i64: 1, 128>}, {pipeline_mode = #tpu.pipeline_mode<synchronous>, transform_indices = @transform_3, window_bounds = array<i64: 128, 128>}, {pipeline_mode = #tpu.pipeline_mode<synchronous>, transform_indices = @transform_4, window_bounds = array<i64: 1, 128>}, {pipeline_mode = #tpu.pipeline_mode<synchronous>, transform_indices = @transform_5, window_bounds = array<i64: 128, 128>}, {pipeline_mode = #tpu.pipeline_mode<synchronous>, transform_indices = @transform_6, window_bounds = array<i64: 1, 128>}, {transform_indices = @transform_7, window_bounds = array<i64: 8, 128>}]} {
    %c0 = arith.constant 0 : index
    %c0_0 = arith.constant 0 : index
    %0 = vector.load %arg1[%c0, %c0_0] : memref<8x16xf32, #tpu.memory_space<vmem>>, vector<8x16xf32>
    %1 = arith.truncf %0 : vector<8x16xf32> to vector<8x16xbf16>
    %c0_1 = arith.constant 0 : index
    %c0_2 = arith.constant 0 : index
    %2 = vector.load %arg2[%c0_1, %c0_2] : memref<16x128xbf16, #tpu.memory_space<vmem>>, vector<16x128xbf16>
    %cst = arith.constant dense<0.000000e+00> : vector<8x128xf32>
    %3 = tpu.matmul %1, %2, %cst {dimension_numbers = #tpu.dot_dimension_numbers<[1], [0], [0], [1], [0, 0, 1, 1], [], []>} : vector<8x16xbf16>, vector<16x128xbf16>, vector<8x128xf32> -> vector<8x128xf32>
    %c0_3 = arith.constant 0 : index
    %c0_4 = arith.constant 0 : index
    %4 = vector.load %arg3[%c0_3, %c0_4] : memref<1x128xf32, #tpu.memory_space<vmem>>, vector<1x128xf32>
    %5 = vector.broadcast %4 : vector<1x128xf32> to vector<8x128xf32>
    %6 = arith.addf %3, %5 : vector<8x128xf32>
    %cst_5 = arith.constant 0.000000e+00 : f32
    %7 = vector.broadcast %cst_5 : f32 to vector<8x128xf32>
    %8 = arith.maximumf %6, %7 : vector<8x128xf32>
    %9 = arith.truncf %8 : vector<8x128xf32> to vector<8x128xbf16>
    %c0_6 = arith.constant 0 : index
    %c0_7 = arith.constant 0 : index
    %10 = vector.load %arg4[%c0_6, %c0_7] : memref<128x128xbf16, #tpu.memory_space<vmem>>, vector<128x128xbf16>
    %cst_8 = arith.constant dense<0.000000e+00> : vector<8x128xf32>
    %11 = tpu.matmul %9, %10, %cst_8 {dimension_numbers = #tpu.dot_dimension_numbers<[1], [0], [0], [1], [0, 0, 1, 1], [], []>} : vector<8x128xbf16>, vector<128x128xbf16>, vector<8x128xf32> -> vector<8x128xf32>
    %c0_9 = arith.constant 0 : index
    %c0_10 = arith.constant 0 : index
    %12 = vector.load %arg5[%c0_9, %c0_10] : memref<1x128xf32, #tpu.memory_space<vmem>>, vector<1x128xf32>
    %13 = vector.broadcast %12 : vector<1x128xf32> to vector<8x128xf32>
    %14 = arith.addf %11, %13 : vector<8x128xf32>
    %cst_11 = arith.constant 0.000000e+00 : f32
    %15 = vector.broadcast %cst_11 : f32 to vector<8x128xf32>
    %16 = arith.maximumf %14, %15 : vector<8x128xf32>
    %17 = arith.truncf %16 : vector<8x128xf32> to vector<8x128xbf16>
    %c0_12 = arith.constant 0 : index
    %c0_13 = arith.constant 0 : index
    %18 = vector.load %arg6[%c0_12, %c0_13] : memref<128x128xbf16, #tpu.memory_space<vmem>>, vector<128x128xbf16>
    %cst_14 = arith.constant dense<0.000000e+00> : vector<8x128xf32>
    %19 = tpu.matmul %17, %18, %cst_14 {dimension_numbers = #tpu.dot_dimension_numbers<[1], [0], [0], [1], [0, 0, 1, 1], [], []>} : vector<8x128xbf16>, vector<128x128xbf16>, vector<8x128xf32> -> vector<8x128xf32>
    %c0_15 = arith.constant 0 : index
    %c0_16 = arith.constant 0 : index
    %20 = vector.load %arg7[%c0_15, %c0_16] : memref<1x128xf32, #tpu.memory_space<vmem>>, vector<1x128xf32>
    %21 = vector.broadcast %20 : vector<1x128xf32> to vector<8x128xf32>
    %22 = arith.addf %19, %21 : vector<8x128xf32>
    %c0_17 = arith.constant 0 : index
    %c0_18 = arith.constant 0 : index
    %23 = vector.load %arg8[%c0_17, %c0_18] : memref<8x128xf32, #tpu.memory_space<vmem>>, vector<8x128xf32>
    tpu.vector_store %arg8[%c0_17, %c0_18], %22 {strides = array<i32>} : memref<8x128xf32, #tpu.memory_space<vmem>>, vector<8x128xf32>,
    return
  }
  func.func @transform_0(%arg0: i32) -> (i32, i32) {
    %c0_i32 = arith.constant 0 : i32
    %c0_i32_0 = arith.constant 0 : i32
    return %arg0, %c0_i32 : i32, i32
  }
  func.func @transform_1(%arg0: i32) -> (i32, i32) {
    %c0_i32 = arith.constant 0 : i32
    %c0_i32_0 = arith.constant 0 : i32
    %c0_i32_1 = arith.constant 0 : i32
    return %c0_i32, %c0_i32_0 : i32, i32
  }
  func.func @transform_2(%arg0: i32) -> (i32, i32) {
    %c0_i32 = arith.constant 0 : i32
    %c0_i32_0 = arith.constant 0 : i32
    %c0_i32_1 = arith.constant 0 : i32
    return %c0_i32, %c0_i32_0 : i32, i32
  }
  func.func @transform_3(%arg0: i32) -> (i32, i32) {
    %c0_i32 = arith.constant 0 : i32
    %c0_i32_0 = arith.constant 0 : i32
    %c0_i32_1 = arith.constant 0 : i32
    return %c0_i32, %c0_i32_0 : i32, i32
  }
  func.func @transform_4(%arg0: i32) -> (i32, i32) {
    %c0_i32 = arith.constant 0 : i32
    %c0_i32_0 = arith.constant 0 : i32
    %c0_i32_1 = arith.constant 0 : i32
    return %c0_i32, %c0_i32_0 : i32, i32
  }
  func.func @transform_5(%arg0: i32) -> (i32, i32) {
    %c0_i32 = arith.constant 0 : i32
    %c0_i32_0 = arith.constant 0 : i32
    %c0_i32_1 = arith.constant 0 : i32
    return %c0_i32, %c0_i32_0 : i32, i32
  }
  func.func @transform_6(%arg0: i32) -> (i32, i32) {
    %c0_i32 = arith.constant 0 : i32
    %c0_i32_0 = arith.constant 0 : i32
    %c0_i32_1 = arith.constant 0 : i32
    return %c0_i32, %c0_i32_0 : i32, i32
  }
  func.func @transform_7(%arg0: i32) -> (i32, i32) {
    %c0_i32 = arith.constant 0 : i32
    %c0_i32_0 = arith.constant 0 : i32
    return %arg0, %c0_i32 : i32, i32
  }
}

</mosaic_0001>

<bundles_post_ra>
// kernel: tpu_custom_call.1
= control target key start
LH: loop header
LB: loop body
LE: loop exit
PB: predicated region body
PF: predicated region fallthrough
CT: control target
= control target key end

     0   :  { %12 = vsyncpa [#allocation3], 0  ;;  %s601_s0 = inlined_call_operand.hbm [shape: f32[8,16], index: 0, kind: input, shape index: {}]   ;;  %s602_s1 = inlined_call_operand.hbm [shape: bf16[16,128], index: 1, kind: input, shape index: {}]   ;;  %s603_s2 = inlined_call_operand.vmem [shape: f32[1,128], index: 2, kind: input, shape index: {}]   ;;  %s604_s3 = inlined_call_operand.hbm [shape: bf16[128,128], index: 3, kind: input, shape index: {}]   ;;  %s605_s4 = inlined_call_operand.vmem [shape: f32[1,128], index: 4, kind: input, shape index: {}]   ;;  %s606_s5 = inlined_call_operand.hbm [shape: bf16[128,128], index: 5, kind: input, shape index: {}]   ;;  %s607_s6 = inlined_call_operand.vmem [shape: f32[1,128], index: 6, kind: input, shape index: {}]   ;;  %s608_s7 = inlined_call_operand.hbm [shape: f32[8,128], index: 7, kind: output, shape index: {}]  }
   0x1   :  { %13 = vsyncpa [#allocation6], 0 }
   0x2   :  { %14 = vsyncpa [#allocation9], 0  ;;  %s31_s26 = sshll.u32 %s602_s1, 4  ;;  %s32_s26 = int_to_ptr.hbm [resolvable:$true] %s31_s26 }
   0x3   :  { %15 = vsyncpa [#allocation4], 0  ;;  %s530_s27 = smov [#allocation5]   ;;  %s21_s8 = sshll.u32 %s601_s0, 4  ;;  %s22_s8 = int_to_ptr.hbm [resolvable:$true] %s21_s8 }
   0x4   :  { %s33_s28 = sshll.u32 %s530_s27, 4  ;;  %s531_s9 = smov 64   ;;  %s34_s28 = int_to_ptr.vmem [resolvable:$true] %s33_s28 }
   0x5   :  { %s532_s10 = smov 4   ;;  %s533_s11 = smov [#allocation2]  }
   0x6   :  { %39 = dma.hbm_to_vmem [thread:$0]  %s32_s26, 128, %s34_s28, [#allocation6], %s531_s9, %s531_s9, %s532_s10  }
   0x7   :  { %s23_s12 = sshll.u32 %s533_s11, 4  ;;  %s46_s15 = sshll.u32 %s604_s3, 4  ;;  %s24_s12 = int_to_ptr.vmem [resolvable:$true] %s23_s12  ;;  %s47_s15 = int_to_ptr.hbm [resolvable:$true] %s46_s15 }
   0x8   :  { %26 = dma.hbm_to_vmem [thread:$0]  %s22_s8, 128, %s24_s12, [#allocation3]  }
   0x9   :  { %s61_s17 = sshll.u32 %s606_s5, 4  ;;  %s534_s18 = smov [#allocation7]   ;;  %s62_s17 = int_to_ptr.hbm [resolvable:$true] %s61_s17 }
   0xa   :  { %s48_s19 = sshll.u32 %s534_s18, 4  ;;  %s535_s0 = smov [#allocation8]   ;;  %s49_s19 = int_to_ptr.vmem [resolvable:$true] %s48_s19 }
   0xb   :  { %54 = dma.hbm_to_vmem [thread:$0]  %s47_s15, 1024, %s49_s19, [#allocation6], %s531_s9, %s531_s9, %s532_s10  }
   0xc   :  { %s63_s20 = sshll.u32 %s535_s0, 4  ;;  %s64_s20 = int_to_ptr.vmem [resolvable:$true] %s63_s20 }
   0xd   :  { %69 = dma.hbm_to_vmem [thread:$0]  %s62_s17, 1024, %s64_s20, [#allocation9], %s531_s9, %s531_s9, %s532_s10  }
   0xe   :  { %522 = dma.done.wait [#allocation3], 128  }
   0xf   :  { %523 = vsyncadd [#allocation3], 4294967168 }
  0x10   :  { %524 = dma.done.wait [#allocation6], 1152  }
  0x11   :  { %525 = vsyncadd [#allocation6], 4294966144 }
  0x12   :  { %526 = dma.done.wait [#allocation9], 1024  }
  0x13   :  { %527 = vsyncadd [#allocation9], 4294966272  ;;  %v375_v0 = vld [vmem:[#allocation5] sm:$0xff]  ;;  %v89_v1 = vld [vmem:[#allocation2] sm:$0xff]  ;;  %vm103_vm0 = vcmask 130048   ;;  %s536_s24 = smov [#allocation10]  }
  0x14   :  { %v383_v2 = vld [vmem:[#allocation7 + $0x38] sm:$0xff]  ;;  %v90_v3 = vpack.c.bf16 %v89_v1, %v89_v1  ;;  %114 = vmatpush.bf16.msra.mxu0 %v375_v0  ;;  %v382_v4 = vld [vmem:[#allocation7 + $0x30] sm:$0xff]  ;;  %v381_v5 = vld [vmem:[#allocation7 + $0x28] sm:$0xff]  ;;  %s292_s25 = sshll.u32 %s536_s24, 4  ;;  %s294_s28 = sshll.u32 %s608_s7, 4  ;;  %s293_s25 = int_to_ptr.vmem [resolvable:$true] %s292_s25  ;;  %s295_s28 = int_to_ptr.hbm [resolvable:$true] %s294_s28 }
  0x15   :  { %190 = vmatpush.bf16.msra.mxu1 %v383_v2  ;;  %v380_v6 = vld [vmem:[#allocation7 + $0x20] sm:$0xff]  ;;  %v379_v7 = vld [vmem:[#allocation7 + $0x18] sm:$0xff]  ;;  %v378_v8 = vld [vmem:[#allocation7 + $0x10] sm:$0xff] }
  0x16   :  { %v377_v9 = vld [vmem:[#allocation7 + $0x8] sm:$0xff]  ;;  %v376_v10 = vld [vmem:[#allocation7] sm:$0xff]  ;;  %v391_v11 = vld [vmem:[#allocation8 + $0x38] sm:$0xff] }
  0x17   :  { %310 = vmatmul.msk.bf16.vlgmr.msra.gmra.mxu0 %vm103_vm0, %v90_v3  ;;  %273 = vmatpush.bf16.msra.mxu2 %v391_v11  ;;  %v390_v12 = vld [vmem:[#allocation8 + $0x30] sm:$0xff]  ;;  %v389_v13 = vld [vmem:[#allocation8 + $0x28] sm:$0xff]  ;;  %v388_v14 = vld [vmem:[#allocation8 + $0x20] sm:$0xff] }
  0x18   :  { %v387_v15 = vld [vmem:[#allocation8 + $0x18] sm:$0xff]  ;;  %v386_v16 = vld [vmem:[#allocation8 + $0x10] sm:$0xff]  ;;  %v385_v23 = vld [vmem:[#allocation8 + $0x8] sm:$0xff] }
  0x19   :  { %191 = vmatpush.bf16.msra.mxu1 %v382_v4  ;;  %v399_v17 = vld [vmem:[%s603_s2] ss:$0 sm:$0xff]  ;;  %v384_v24 = vld [vmem:[#allocation8] sm:$0xff] }
  0x1a   :  { %v400_v25 = vld [vmem:[%s605_s4] ss:$0 sm:$0xff] }
  0x1b   :  { %274 = vmatpush.bf16.msra.mxu2 %v390_v12  ;;  %v401_v31 = vld [vmem:[%s607_s6] ss:$0 sm:$0xff] }
  0x1d   :  { %192 = vmatpush.bf16.msra.mxu1 %v381_v5 }
  0x1f   :  { %275 = vmatpush.bf16.msra.mxu2 %v389_v13 }
  0x21   :  { %193 = vmatpush.bf16.msra.mxu1 %v380_v6 }
  0x23   :  { %276 = vmatpush.bf16.msra.mxu2 %v388_v14 }
  0x25   :  { %194 = vmatpush.bf16.msra.mxu1 %v379_v7 }
  0x27   :  { %277 = vmatpush.bf16.msra.mxu2 %v387_v15 }
  0x29   :  { %195 = vmatpush.bf16.msra.mxu1 %v378_v8 }
  0x2b   :  { %278 = vmatpush.bf16.msra.mxu2 %v386_v16 }
  0x2d   :  { %196 = vmatpush.bf16.msra.mxu1 %v377_v9 }
  0x2f   :  { %279 = vmatpush.bf16.msra.mxu2 %v385_v23 }
  0x31   :  { %197 = vmatpush.bf16.msra.mxu1 %v376_v10 }
  0x33   :  { %280 = vmatpush.bf16.msra.mxu2 %v384_v24 }
  0x94   :  { %v116_v18 = vpop.f32.mrf.mxu0 }
  0x95   :  { %v117_v19 = vadd.f32 %v399_v17, %v116_v18 }
  0x97   :  { %v120_v20 = vmax.f32 %v117_v19, 0.0 }
  0x99   :  { %v121_v21 = vpack.c.bf16 %v120_v20, %v120_v20 }
  0x9b   :  { %198 = vmatmul.bf16.vlgmr.msra.gmra.mxu1 %v121_v21 }
  0x9c   :  { %v118_v22 = vpop.f32.mrf.mxu0 }
 0x118   :  { %v199_v26 = vpop.f32.mrf.mxu1 }
 0x119   :  { %v200_v27 = vadd.f32 %v400_v25, %v199_v26 }
 0x11b   :  { %v203_v28 = vmax.f32 %v200_v27, 0.0 }
 0x11d   :  { %v204_v29 = vpack.c.bf16 %v203_v28, %v203_v28 }
 0x11f   :  { %281 = vmatmul.bf16.vlgmr.msra.gmra.mxu2 %v204_v29 }
 0x120   :  { %v201_v30 = vpop.f32.mrf.mxu1 }
 0x1a2   :  { %v282_v32 = vpop.f32.mrf.mxu2 }
 0x1a3   :  { %v283_v33 = vadd.f32 %v401_v31, %v282_v32 }
 0x1a5   :  { %286 = vst [vmem:[#allocation10] sm:$0xff] %v283_v33 }
 0x1a6   :  { %297 = dma.vmem_to_hbm [thread:$0]  %s293_s25, 128, %s295_s28, [#allocation4]  }
 0x1aa   :  { %v284_v34 = vpop.f32.mrf.mxu2 }
 0x1ab   :  { %528 = dma.done.wait [#allocation4], 128  }
 0x1ac   :  { %529 = vsyncadd [#allocation4], 4294967168 }
 0x1ad   :  { %302 = vsyncpa [#allocation3], 1 }
 0x1ae   :  { %303 = vsyncpa [#allocation6], 1 }
 0x1af   :  { %304 = vsyncpa [#allocation9], 1 }
 0x1b0   :  { %305 = vsyncpa [#allocation4], 1 }

// kernel: tpu_custom_call.1
= control target key start
LH: loop header
LB: loop body
LE: loop exit
PB: predicated region body
PF: predicated region fallthrough
CT: control target
= control target key end

     0   :  { %12 = vsyncpa [#allocation3], 0  ;;  %s601_s0 = inlined_call_operand.hbm [shape: f32[8,16], index: 0, kind: input, shape index: {}]   ;;  %s602_s1 = inlined_call_operand.hbm [shape: bf16[16,128], index: 1, kind: input, shape index: {}]   ;;  %s603_s2 = inlined_call_operand.vmem [shape: f32[1,128], index: 2, kind: input, shape index: {}]   ;;  %s604_s3 = inlined_call_operand.hbm [shape: bf16[128,128], index: 3, kind: input, shape index: {}]   ;;  %s605_s4 = inlined_call_operand.vmem [shape: f32[1,128], index: 4, kind: input, shape index: {}]   ;;  %s606_s5 = inlined_call_operand.hbm [shape: bf16[128,128], index: 5, kind: input, shape index: {}]   ;;  %s607_s6 = inlined_call_operand.vmem [shape: f32[1,128], index: 6, kind: input, shape index: {}]   ;;  %s608_s7 = inlined_call_operand.hbm [shape: f32[8,128], index: 7, kind: output, shape index: {}]  }
   0x1   :  { %13 = vsyncpa [#allocation6], 0 }
   0x2   :  { %14 = vsyncpa [#allocation9], 0  ;;  %s31_s26 = sshll.u32 %s602_s1, 4  ;;  %s32_s26 = int_to_ptr.hbm [resolvable:$true] %s31_s26 }
   0x3   :  { %15 = vsyncpa [#allocation4], 0  ;;  %s530_s27 = smov [#allocation5]   ;;  %s21_s8 = sshll.u32 %s601_s0, 4  ;;  %s22_s8 = int_to_ptr.hbm [resolvable:$true] %s21_s8 }
   0x4   :  { %s33_s28 = sshll.u32 %s530_s27, 4  ;;  %s531_s9 = smov 64   ;;  %s34_s28 = int_to_ptr.vmem [resolvable:$true] %s33_s28 }
   0x5   :  { %s532_s10 = smov 4   ;;  %s533_s11 = smov [#allocation2]  }
   0x6   :  { %39 = dma.hbm_to_vmem [thread:$0]  %s32_s26, 128, %s34_s28, [#allocation6], %s531_s9, %s531_s9, %s532_s10  }
   0x7   :  { %s23_s12 = sshll.u32 %s533_s11, 4  ;;  %s46_s15 = sshll.u32 %s604_s3, 4  ;;  %s24_s12 = int_to_ptr.vmem [resolvable:$true] %s23_s12  ;;  %s47_s15 = int_to_ptr.hbm [resolvable:$true] %s46_s15 }
   0x8   :  { %26 = dma.hbm_to_vmem [thread:$0]  %s22_s8, 128, %s24_s12, [#allocation3]  }
   0x9   :  { %s61_s17 = sshll.u32 %s606_s5, 4  ;;  %s534_s18 = smov [#allocation7]   ;;  %s62_s17 = int_to_ptr.hbm [resolvable:$true] %s61_s17 }
   0xa   :  { %s48_s19 = sshll.u32 %s534_s18, 4  ;;  %s535_s0 = smov [#allocation8]   ;;  %s49_s19 = int_to_ptr.vmem [resolvable:$true] %s48_s19 }
   0xb   :  { %54 = dma.hbm_to_vmem [thread:$0]  %s47_s15, 1024, %s49_s19, [#allocation6], %s531_s9, %s531_s9, %s532_s10  }
   0xc   :  { %s63_s20 = sshll.u32 %s535_s0, 4  ;;  %s64_s20 = int_to_ptr.vmem [resolvable:$true] %s63_s20 }
   0xd   :  { %69 = dma.hbm_to_vmem [thread:$0]  %s62_s17, 1024, %s64_s20, [#allocation9], %s531_s9, %s531_s9, %s532_s10  }
   0xe   :  { %522 = dma.done.wait [#allocation3], 128  }
   0xf   :  { %523 = vsyncadd [#allocation3], 4294967168 }
  0x10   :  { %524 = dma.done.wait [#allocation6], 1152  }
  0x11   :  { %525 = vsyncadd [#allocation6], 4294966144 }
  0x12   :  { %526 = dma.done.wait [#allocation9], 1024  }
  0x13   :  { %527 = vsyncadd [#allocation9], 4294966272  ;;  %v375_v0 = vld [vmem:[#allocation5] sm:$0xff]  ;;  %v89_v1 = vld [vmem:[#allocation2] sm:$0xff]  ;;  %vm103_vm0 = vcmask 130048   ;;  %s536_s24 = smov [#allocation10]  }
  0x14   :  { %v383_v2 = vld [vmem:[#allocation7 + $0x38] sm:$0xff]  ;;  %v90_v3 = vpack.c.bf16 %v89_v1, %v89_v1  ;;  %114 = vmatpush.bf16.msra.mxu0 %v375_v0  ;;  %v382_v4 = vld [vmem:[#allocation7 + $0x30] sm:$0xff]  ;;  %v381_v5 = vld [vmem:[#allocation7 + $0x28] sm:$0xff]  ;;  %s292_s25 = sshll.u32 %s536_s24, 4  ;;  %s294_s28 = sshll.u32 %s608_s7, 4  ;;  %s293_s25 = int_to_ptr.vmem [resolvable:$true] %s292_s25  ;;  %s295_s28 = int_to_ptr.hbm [resolvable:$true] %s294_s28 }
  0x15   :  { %190 = vmatpush.bf16.msra.mxu1 %v383_v2  ;;  %v380_v6 = vld [vmem:[#allocation7 + $0x20] sm:$0xff]  ;;  %v379_v7 = vld [vmem:[#allocation7 + $0x18] sm:$0xff]  ;;  %v378_v8 = vld [vmem:[#allocation7 + $0x10] sm:$0xff] }
  0x16   :  { %v377_v9 = vld [vmem:[#allocation7 + $0x8] sm:$0xff]  ;;  %v376_v10 = vld [vmem:[#allocation7] sm:$0xff]  ;;  %v391_v11 = vld [vmem:[#allocation8 + $0x38] sm:$0xff] }
  0x17   :  { %310 = vmatmul.msk.bf16.vlgmr.msra.gmra.mxu0 %vm103_vm0, %v90_v3  ;;  %273 = vmatpush.bf16.msra.mxu2 %v391_v11  ;;  %v390_v12 = vld [vmem:[#allocation8 + $0x30] sm:$0xff]  ;;  %v389_v13 = vld [vmem:[#allocation8 + $0x28] sm:$0xff]  ;;  %v388_v14 = vld [vmem:[#allocation8 + $0x20] sm:$0xff] }
  0x18   :  { %v387_v15 = vld [vmem:[#allocation8 + $0x18] sm:$0xff]  ;;  %v386_v16 = vld [vmem:[#allocation8 + $0x10] sm:$0xff]  ;;  %v385_v23 = vld [vmem:[#allocation8 + $0x8] sm:$0xff] }
  0x19   :  { %191 = vmatpush.bf16.msra.mxu1 %v382_v4  ;;  %v399_v17 = vld [vmem:[%s603_s2] ss:$0 sm:$0xff]  ;;  %v384_v24 = vld [vmem:[#allocation8] sm:$0xff] }
  0x1a   :  { %v400_v25 = vld [vmem:[%s605_s4] ss:$0 sm:$0xff] }
  0x1b   :  { %274 = vmatpush.bf16.msra.mxu2 %v390_v12  ;;  %v401_v31 = vld [vmem:[%s607_s6] ss:$0 sm:$0xff] }
  0x1d   :  { %192 = vmatpush.bf16.msra.mxu1 %v381_v5 }
  0x1f   :  { %275 = vmatpush.bf16.msra.mxu2 %v389_v13 }
  0x21   :  { %193 = vmatpush.bf16.msra.mxu1 %v380_v6 }
  0x23   :  { %276 = vmatpush.bf16.msra.mxu2 %v388_v14 }
  0x25   :  { %194 = vmatpush.bf16.msra.mxu1 %v379_v7 }
  0x27   :  { %277 = vmatpush.bf16.msra.mxu2 %v387_v15 }
  0x29   :  { %195 = vmatpush.bf16.msra.mxu1 %v378_v8 }
  0x2b   :  { %278 = vmatpush.bf16.msra.mxu2 %v386_v16 }
  0x2d   :  { %196 = vmatpush.bf16.msra.mxu1 %v377_v9 }
  0x2f   :  { %279 = vmatpush.bf16.msra.mxu2 %v385_v23 }
  0x31   :  { %197 = vmatpush.bf16.msra.mxu1 %v376_v10 }
  0x33   :  { %280 = vmatpush.bf16.msra.mxu2 %v384_v24 }
  0x94   :  { %v116_v18 = vpop.f32.mrf.mxu0 }
  0x95   :  { %v117_v19 = vadd.f32 %v399_v17, %v116_v18 }
  0x97   :  { %v120_v20 = vmax.f32 %v117_v19, 0.0 }
  0x99   :  { %v121_v21 = vpack.c.bf16 %v120_v20, %v120_v20 }
  0x9b   :  { %198 = vmatmul.bf16.vlgmr.msra.gmra.mxu1 %v121_v21 }
  0x9c   :  { %v118_v22 = vpop.f32.mrf.mxu0 }
 0x118   :  { %v199_v26 = vpop.f32.mrf.mxu1 }
 0x119   :  { %v200_v27 = vadd.f32 %v400_v25, %v199_v26 }
 0x11b   :  { %v203_v28 = vmax.f32 %v200_v27, 0.0 }
 0x11d   :  { %v204_v29 = vpack.c.bf16 %v203_v28, %v203_v28 }
 0x11f   :  { %281 = vmatmul.bf16.vlgmr.msra.gmra.mxu2 %v204_v29 }
 0x120   :  { %v201_v30 = vpop.f32.mrf.mxu1 }
 0x1a2   :  { %v282_v32 = vpop.f32.mrf.mxu2 }
 0x1a3   :  { %v283_v33 = vadd.f32 %v401_v31, %v282_v32 }
 0x1a5   :  { %286 = vst [vmem:[#allocation10] sm:$0xff] %v283_v33 }
 0x1a6   :  { %297 = dma.vmem_to_hbm [thread:$0]  %s293_s25, 128, %s295_s28, [#allocation4]  }
 0x1aa   :  { %v284_v34 = vpop.f32.mrf.mxu2 }
 0x1ab   :  { %528 = dma.done.wait [#allocation4], 128  }
 0x1ac   :  { %529 = vsyncadd [#allocation4], 4294967168 }
 0x1ad   :  { %302 = vsyncpa [#allocation3], 1 }
 0x1ae   :  { %303 = vsyncpa [#allocation6], 1 }
 0x1af   :  { %304 = vsyncpa [#allocation9], 1 }
 0x1b0   :  { %305 = vsyncpa [#allocation4], 1 }

</bundles_post_ra>
